<compile_context>
chip_gen: v7x
topology: tpu7x:2x2x1
jax: 0.10.0
libtpu: 0.0.40
codegen_flags: <defaults>
</compile_context>

<pallas_src>
import functools

import jax
import jax.numpy as jnp
from jax.experimental import pallas as pl
from jax.experimental.pallas import tpu as pltpu


# ----------------------------- helpers ---------------------------------------

def _apply_activation(h, activation):
    """Static (trace-time) selection of self.activation_fn[self.activation]."""
    if activation == "relu":
        return jnp.maximum(h, 0.0)
    if activation == "gelu":
        return jax.nn.gelu(h, approximate=False)   # matches nn.GELU() (erf form)
    if activation == "elu":
        return jnp.where(h > 0, h, jnp.expm1(h))
    if activation == "sigmoid":
        return jax.nn.sigmoid(h)
    if activation == "tanh":
        return jnp.tanh(h)
    raise ValueError(f"unknown activation: {activation}")


# ----------------------------- fused kernel ----------------------------------

def _fused_gaze_kernel(ids_ref,                       # scalar-prefetch: (N,) int32 in SMEM
                       emb_ref, w_enc_ref, b_enc_ref, # synthetic encoder params
                       w_dense_ref, w_wlen_ref, w_prop_ref, b_dense_ref,
                       w_out_ref, b_out_ref,          # head params (b_out in SMEM)
                       wlen_ref, prop_ref,            # per-row extra features
                       o_ref,                         # (TILE_N, OUT_LANES) lane-dense out
                       emb_scratch,                   # (TILE_N, D) f32 VMEM scratch
                       *, tile_n, activation):
    row_base = pl.program_id(0) * tile_n

    # --- embedding gather for this row tile (data-dependent, ids from SMEM) ---
    # Unrolled Python loop: tile_n is small, so the LLO scheduler can interleave
    # the dynamic sublane loads/stores with the surrounding vector work.
    # TODO(synk): for a real 50k x 768 table keep it in HBM (memory_space=pl.ANY)
    # and DMA-gather rows with make_async_copy; here the tiny table is VMEM-resident.
    for r in range(tile_n):
        tok = ids_ref[row_base + r]
        emb_scratch[pl.ds(r, 1), :] = emb_ref[pl.ds(tok, 1), :]

    x = emb_scratch[...].astype(jnp.bfloat16)                      # (tile_n, D)

    # --- synthetic "pretrained" encoder: tanh(x @ W_enc + b_enc) --------------
    h = jnp.dot(x, w_enc_ref[...], preferred_element_type=jnp.float32)
    h = jnp.tanh(h + b_enc_ref[...])                               # f32 (tile_n, D)

    # --- head dense: K stays = D (128-aligned) --------------------------------
    # wlen/prop columns of the PyTorch (hidden, input_dim+2) weight are applied
    # as rank-1 VPU updates so the MXU matmul keeps an aligned K dimension.
    extra = (wlen_ref[...] * w_wlen_ref[...]
             + prop_ref[...] * w_prop_ref[...]
             + b_dense_ref[...])                                   # f32 (tile_n, H)
    h2 = jnp.dot(h.astype(jnp.bfloat16), w_dense_ref[...],
                 preferred_element_type=jnp.float32)
    h2 = _apply_activation(h2 + extra, activation)                 # f32 (tile_n, H)

    # --- out_proj as a reduction (no 1-lane MXU matmul), lane-dense store -----
    y = jnp.sum(h2 * w_out_ref[...], axis=-1, keepdims=True) + b_out_ref[0, 0]
    o_ref[...] = jnp.broadcast_to(y, o_ref.shape)


# ----------------------------- full forward ----------------------------------

def roberta_for_gaze_prediction(params, input_ids, first_idx, wlen, prop,
                                activation="tanh",
                                ablate_wlen=False, ablate_prop=False,
                                tile_n=8, out_lanes=128):
    B, S = input_ids.shape
    n_sel = first_idx.shape[1]
    N = B * n_sel

    # x = cat([x[i][first_idx[i]]]) folded into the kernel: since the synthetic
    # encoder is per-token, gather the selected token ids up-front and only
    # encode those rows (identical result, far less work).
    sel_ids = jnp.take_along_axis(input_ids, first_idx, axis=1).reshape(-1)
    sel_ids = sel_ids.astype(jnp.int32)

    if ablate_wlen:
        wlen = jnp.zeros_like(wlen)
    if ablate_prop:
        prop = jnp.zeros_like(prop)

    # pad rows up to a multiple of tile_n (extra rows discarded after the call)
    n_pad = -(-N // tile_n) * tile_n
    if n_pad != N:
        pad = n_pad - N
        sel_ids = jnp.pad(sel_ids, (0, pad))
        wlen = jnp.pad(wlen, ((0, pad), (0, 0)))
        prop = jnp.pad(prop, ((0, pad), (0, 0)))

    vocab, D = params["emb_table"].shape
    H = params["w_dense"].shape[1]
    grid = (n_pad // tile_n,)

    pin = lambda i, ids: (0, 0)    # weights stay resident across the row grid
    row = lambda i, ids: (i, 0)    # per-row-tile blocks

    kernel = functools.partial(_fused_gaze_kernel, tile_n=tile_n,
                               activation=activation)

    out_wide = pl.pallas_call(
        kernel,
        out_shape=jax.ShapeDtypeStruct((n_pad, out_lanes), jnp.float32),
        grid_spec=pltpu.PrefetchScalarGridSpec(
            num_scalar_prefetch=1,                      # sel_ids -> SMEM
            grid=grid,
            in_specs=[
                pl.BlockSpec((vocab, D), pin),          # emb_table   (f32, resident)
                pl.BlockSpec((D, D), pin),              # w_enc       (bf16)
                pl.BlockSpec((1, D), pin),              # b_enc       (f32)
                pl.BlockSpec((D, H), pin),              # w_dense[:D] (bf16)
                pl.BlockSpec((1, H), pin),              # w_dense[D]  (wlen col, f32)
                pl.BlockSpec((1, H), pin),              # w_dense[D+1](prop col, f32)
                pl.BlockSpec((1, H), pin),              # b_dense     (f32)
                pl.BlockSpec((1, H), pin),              # w_out row   (f32)
                pl.BlockSpec(memory_space=pltpu.MemorySpace.SMEM),   # b_out scalar
                pl.BlockSpec((tile_n, 1), row),         # wlen
                pl.BlockSpec((tile_n, 1), row),         # prop
            ],
            out_specs=pl.BlockSpec((tile_n, out_lanes), row),
            scratch_shapes=[pltpu.VMEM((tile_n, D), jnp.float32)],
        ),
        compiler_params=pltpu.CompilerParams(
            dimension_semantics=("parallel",),          # row tiles split across TCs
            vmem_limit_bytes=32 * 1024 * 1024,
        ),
    )(sel_ids,
      params["emb_table"], params["w_enc"], params["b_enc"],
      params["w_dense"], params["w_wlen"], params["w_prop"], params["b_dense"],
      params["w_out"], params["b_out"],
      wlen, prop)

    return out_wide[:N, :1]                             # slice lane-dense slab -> (N, 1)


# ----------------------------- pure-JAX reference ----------------------------

def _reference(params, input_ids, first_idx, wlen, prop, activation):
    """Mirrors module semantics (encode full seq, then gather) with the same
    bf16-operand / f32-accumulation matmul strategy as the kernel."""
    B, S = input_ids.shape
    emb = params["emb_table"][input_ids.reshape(-1)].astype(jnp.bfloat16)
    h = jnp.dot(emb, params["w_enc"], preferred_element_type=jnp.float32)
    seq = jnp.tanh(h + params["b_enc"]).reshape(B, S, -1)
    g = jnp.take_along_axis(seq, first_idx[..., None], axis=1)
    g = g.reshape(B * first_idx.shape[1], -1)
    h2 = jnp.dot(g.astype(jnp.bfloat16), params["w_dense"],
                 preferred_element_type=jnp.float32)
    h2 = h2 + wlen * params["w_wlen"] + prop * params["w_prop"] + params["b_dense"]
    h2 = _apply_activation(h2, activation)
    return jnp.sum(h2 * params["w_out"], axis=-1, keepdims=True) + params["b_out"][0, 0]


# ----------------------------- demo ------------------------------------------

if __name__ == "__main__":
    key = jax.random.PRNGKey(0)
    B, S, n_sel = 2, 16, 8
    vocab = 64
    input_dim, hidden_dim = 128, 128
    activation = "tanh"

    ks = jax.random.split(key, 12)
    # TODO(synk): the opaque `pretrained` RoBERTa stack is replaced by a
    # deterministic synthetic per-token encoder (embedding + dense + tanh).
    params = {
        "emb_table": 0.1 * jax.random.normal(ks[0], (vocab, input_dim), jnp.float32),
        "w_enc":     (0.1 * jax.random.normal(ks[1], (input_dim, input_dim),
                                              jnp.float32)).astype(jnp.bfloat16),
        "b_enc":     0.1 * jax.random.normal(ks[2], (1, input_dim), jnp.float32),
        # PyTorch dense weight (hidden, input_dim+2) split & transposed:
        "w_dense":   (0.1 * jax.random.normal(ks[3], (input_dim, hidden_dim),
                                              jnp.float32)).astype(jnp.bfloat16),
        "w_wlen":    0.1 * jax.random.normal(ks[4], (1, hidden_dim), jnp.float32),
        "w_prop":    0.1 * jax.random.normal(ks[5], (1, hidden_dim), jnp.float32),
        "b_dense":   0.1 * jax.random.normal(ks[6], (1, hidden_dim), jnp.float32),
        # out_proj weight (1, hidden) kept as a row vector for the reduction:
        "w_out":     0.1 * jax.random.normal(ks[7], (1, hidden_dim), jnp.float32),
        "b_out":     0.1 * jax.random.normal(ks[8], (1, 1), jnp.float32),
    }

    input_ids = jax.random.randint(ks[9], (B, S), 0, vocab, dtype=jnp.int32)
    # per-sentence word-start indices
    first_idx = jnp.stack([jnp.arange(0, 2 * n_sel, 2, dtype=jnp.int32),
                           jnp.arange(1, 2 * n_sel, 2, dtype=jnp.int32)])
    wlen = jax.random.uniform(ks[10], (B * n_sel, 1), jnp.float32)
    prop = jax.random.uniform(ks[11], (B * n_sel, 1), jnp.float32)

    out = roberta_for_gaze_prediction(params, input_ids, first_idx, wlen, prop,
                                      activation=activation)
    out = jax.block_until_ready(out)

    ref = _reference(params, input_ids, first_idx, wlen, prop, activation)
    assert out.shape == (B * n_sel, 1), out.shape
    assert jnp.allclose(out, ref, atol=2e-3, rtol=2e-3), (out, ref)

    print("KERNEL_OK")
</pallas_src>

<mosaic_0001>
module attributes {stable_mosaic.version = 11 : i64} {
  func.func @_fused_gaze_kernel(%arg0: i32, %arg1: memref<16xi32, #tpu.memory_space<smem>>, %arg2: memref<64x128xf32, #tpu.memory_space<vmem>>, %arg3: memref<128x128xbf16, #tpu.memory_space<vmem>>, %arg4: memref<1x128xf32, #tpu.memory_space<vmem>>, %arg5: memref<128x128xbf16, #tpu.memory_space<vmem>>, %arg6: memref<1x128xf32, #tpu.memory_space<vmem>>, %arg7: memref<1x128xf32, #tpu.memory_space<vmem>>, %arg8: memref<1x128xf32, #tpu.memory_space<vmem>>, %arg9: memref<1x128xf32, #tpu.memory_space<vmem>>, %arg10: memref<1x1xf32, #tpu.memory_space<smem>>, %arg11: memref<8x1xf32, #tpu.memory_space<vmem>>, %arg12: memref<8x1xf32, #tpu.memory_space<vmem>>, %arg13: memref<8x128xf32, #tpu.memory_space<vmem>>, %arg14: memref<8x128xf32, #tpu.memory_space<vmem>>) attributes {dimension_semantics = [#tpu.dimension_semantics<parallel>], iteration_bounds = array<i64: 2>, scalar_prefetch = 1 : i64, scratch_operands = 1 : i64, tpu.core_type = #tpu.core_type<tc>, window_params = [{pipeline_mode = #tpu.pipeline_mode<synchronous>, transform_indices = @transform_0, window_bounds = array<i64: 64, 128>}, {pipeline_mode = #tpu.pipeline_mode<synchronous>, transform_indices = @transform_1, window_bounds = array<i64: 128, 128>}, {pipeline_mode = #tpu.pipeline_mode<synchronous>, transform_indices = @transform_2, window_bounds = array<i64: 1, 128>}, {pipeline_mode = #tpu.pipeline_mode<synchronous>, transform_indices = @transform_3, window_bounds = array<i64: 128, 128>}, {pipeline_mode = #tpu.pipeline_mode<synchronous>, transform_indices = @transform_4, window_bounds = array<i64: 1, 128>}, {pipeline_mode = #tpu.pipeline_mode<synchronous>, transform_indices = @transform_5, window_bounds = array<i64: 1, 128>}, {pipeline_mode = #tpu.pipeline_mode<synchronous>, transform_indices = @transform_6, window_bounds = array<i64: 1, 128>}, {pipeline_mode = #tpu.pipeline_mode<synchronous>, transform_indices = @transform_7, window_bounds = array<i64: 1, 128>}, {transform_indices = @transform_8, window_bounds = array<i64: 1, 1>}, {transform_indices = @transform_9, window_bounds = array<i64: 8, 1>}, {transform_indices = @transform_10, window_bounds = array<i64: 8, 1>}, {transform_indices = @transform_11, window_bounds = array<i64: 8, 128>}]} {
    %c8_i32 = arith.constant 8 : i32
    %0 = arith.muli %arg0, %c8_i32 : i32
    %c0_i32 = arith.constant 0 : i32
    %1 = arith.addi %0, %c0_i32 : i32
    %2 = arith.index_cast %1 : i32 to index
    %3 = memref.load %arg1[%2] : memref<16xi32, #tpu.memory_space<smem>>
    %4 = arith.index_cast %3 : i32 to index
    %c0 = arith.constant 0 : index
    %5 = vector.load %arg2[%4, %c0] : memref<64x128xf32, #tpu.memory_space<vmem>>, vector<1x128xf32>
    %c0_0 = arith.constant 0 : index
    %c0_1 = arith.constant 0 : index
    %6 = vector.load %arg14[%c0_0, %c0_1] : memref<8x128xf32, #tpu.memory_space<vmem>>, vector<1x128xf32>
    tpu.vector_store %arg14[%c0_0, %c0_1], %5 {strides = array<i32>} : memref<8x128xf32, #tpu.memory_space<vmem>>, vector<1x128xf32>,
    %c1_i32 = arith.constant 1 : i32
    %7 = arith.addi %0, %c1_i32 : i32
    %8 = arith.index_cast %7 : i32 to index
    %9 = memref.load %arg1[%8] : memref<16xi32, #tpu.memory_space<smem>>
    %10 = arith.index_cast %9 : i32 to index
    %c0_2 = arith.constant 0 : index
    %11 = vector.load %arg2[%10, %c0_2] : memref<64x128xf32, #tpu.memory_space<vmem>>, vector<1x128xf32>
    %c1 = arith.constant 1 : index
    %c0_3 = arith.constant 0 : index
    %12 = vector.load %arg14[%c1, %c0_3] : memref<8x128xf32, #tpu.memory_space<vmem>>, vector<1x128xf32>
    tpu.vector_store %arg14[%c1, %c0_3], %11 {strides = array<i32>} : memref<8x128xf32, #tpu.memory_space<vmem>>, vector<1x128xf32>,
    %c2_i32 = arith.constant 2 : i32
    %13 = arith.addi %0, %c2_i32 : i32
    %14 = arith.index_cast %13 : i32 to index
    %15 = memref.load %arg1[%14] : memref<16xi32, #tpu.memory_space<smem>>
    %16 = arith.index_cast %15 : i32 to index
    %c0_4 = arith.constant 0 : index
    %17 = vector.load %arg2[%16, %c0_4] : memref<64x128xf32, #tpu.memory_space<vmem>>, vector<1x128xf32>
    %c2 = arith.constant 2 : index
    %c0_5 = arith.constant 0 : index
    %18 = vector.load %arg14[%c2, %c0_5] : memref<8x128xf32, #tpu.memory_space<vmem>>, vector<1x128xf32>
    tpu.vector_store %arg14[%c2, %c0_5], %17 {strides = array<i32>} : memref<8x128xf32, #tpu.memory_space<vmem>>, vector<1x128xf32>,
    %c3_i32 = arith.constant 3 : i32
    %19 = arith.addi %0, %c3_i32 : i32
    %20 = arith.index_cast %19 : i32 to index
    %21 = memref.load %arg1[%20] : memref<16xi32, #tpu.memory_space<smem>>
    %22 = arith.index_cast %21 : i32 to index
    %c0_6 = arith.constant 0 : index
    %23 = vector.load %arg2[%22, %c0_6] : memref<64x128xf32, #tpu.memory_space<vmem>>, vector<1x128xf32>
    %c3 = arith.constant 3 : index
    %c0_7 = arith.constant 0 : index
    %24 = vector.load %arg14[%c3, %c0_7] : memref<8x128xf32, #tpu.memory_space<vmem>>, vector<1x128xf32>
    tpu.vector_store %arg14[%c3, %c0_7], %23 {strides = array<i32>} : memref<8x128xf32, #tpu.memory_space<vmem>>, vector<1x128xf32>,
    %c4_i32 = arith.constant 4 : i32
    %25 = arith.addi %0, %c4_i32 : i32
    %26 = arith.index_cast %25 : i32 to index
    %27 = memref.load %arg1[%26] : memref<16xi32, #tpu.memory_space<smem>>
    %28 = arith.index_cast %27 : i32 to index
    %c0_8 = arith.constant 0 : index
    %29 = vector.load %arg2[%28, %c0_8] : memref<64x128xf32, #tpu.memory_space<vmem>>, vector<1x128xf32>
    %c4 = arith.constant 4 : index
    %c0_9 = arith.constant 0 : index
    %30 = vector.load %arg14[%c4, %c0_9] : memref<8x128xf32, #tpu.memory_space<vmem>>, vector<1x128xf32>
    tpu.vector_store %arg14[%c4, %c0_9], %29 {strides = array<i32>} : memref<8x128xf32, #tpu.memory_space<vmem>>, vector<1x128xf32>,
    %c5_i32 = arith.constant 5 : i32
    %31 = arith.addi %0, %c5_i32 : i32
    %32 = arith.index_cast %31 : i32 to index
    %33 = memref.load %arg1[%32] : memref<16xi32, #tpu.memory_space<smem>>
    %34 = arith.index_cast %33 : i32 to index
    %c0_10 = arith.constant 0 : index
    %35 = vector.load %arg2[%34, %c0_10] : memref<64x128xf32, #tpu.memory_space<vmem>>, vector<1x128xf32>
    %c5 = arith.constant 5 : index
    %c0_11 = arith.constant 0 : index
    %36 = vector.load %arg14[%c5, %c0_11] : memref<8x128xf32, #tpu.memory_space<vmem>>, vector<1x128xf32>
    tpu.vector_store %arg14[%c5, %c0_11], %35 {strides = array<i32>} : memref<8x128xf32, #tpu.memory_space<vmem>>, vector<1x128xf32>,
    %c6_i32 = arith.constant 6 : i32
    %37 = arith.addi %0, %c6_i32 : i32
    %38 = arith.index_cast %37 : i32 to index
    %39 = memref.load %arg1[%38] : memref<16xi32, #tpu.memory_space<smem>>
    %40 = arith.index_cast %39 : i32 to index
    %c0_12 = arith.constant 0 : index
    %41 = vector.load %arg2[%40, %c0_12] : memref<64x128xf32, #tpu.memory_space<vmem>>, vector<1x128xf32>
    %c6 = arith.constant 6 : index
    %c0_13 = arith.constant 0 : index
    %42 = vector.load %arg14[%c6, %c0_13] : memref<8x128xf32, #tpu.memory_space<vmem>>, vector<1x128xf32>
    tpu.vector_store %arg14[%c6, %c0_13], %41 {strides = array<i32>} : memref<8x128xf32, #tpu.memory_space<vmem>>, vector<1x128xf32>,
    %c7_i32 = arith.constant 7 : i32
    %43 = arith.addi %0, %c7_i32 : i32
    %44 = arith.index_cast %43 : i32 to index
    %45 = memref.load %arg1[%44] : memref<16xi32, #tpu.memory_space<smem>>
    %46 = arith.index_cast %45 : i32 to index
    %c0_14 = arith.constant 0 : index
    %47 = vector.load %arg2[%46, %c0_14] : memref<64x128xf32, #tpu.memory_space<vmem>>, vector<1x128xf32>
    %c7 = arith.constant 7 : index
    %c0_15 = arith.constant 0 : index
    %48 = vector.load %arg14[%c7, %c0_15] : memref<8x128xf32, #tpu.memory_space<vmem>>, vector<1x128xf32>
    tpu.vector_store %arg14[%c7, %c0_15], %47 {strides = array<i32>} : memref<8x128xf32, #tpu.memory_space<vmem>>, vector<1x128xf32>,
    %c0_16 = arith.constant 0 : index
    %c0_17 = arith.constant 0 : index
    %49 = vector.load %arg14[%c0_16, %c0_17] : memref<8x128xf32, #tpu.memory_space<vmem>>, vector<8x128xf32>
    %50 = arith.truncf %49 : vector<8x128xf32> to vector<8x128xbf16>
    %c0_18 = arith.constant 0 : index
    %c0_19 = arith.constant 0 : index
    %51 = vector.load %arg3[%c0_18, %c0_19] : memref<128x128xbf16, #tpu.memory_space<vmem>>, vector<128x128xbf16>
    %cst = arith.constant dense<0.000000e+00> : vector<8x128xf32>
    %52 = tpu.matmul %50, %51, %cst {dimension_numbers = #tpu.dot_dimension_numbers<[1], [0], [0], [1], [0, 0, 1, 1], [], []>} : vector<8x128xbf16>, vector<128x128xbf16>, vector<8x128xf32> -> vector<8x128xf32>
    %c0_20 = arith.constant 0 : index
    %c0_21 = arith.constant 0 : index
    %53 = vector.load %arg4[%c0_20, %c0_21] : memref<1x128xf32, #tpu.memory_space<vmem>>, vector<1x128xf32>
    %54 = vector.broadcast %53 : vector<1x128xf32> to vector<8x128xf32>
    %55 = arith.addf %52, %54 : vector<8x128xf32>
    %56 = math.tanh %55 : vector<8x128xf32>
    %c0_22 = arith.constant 0 : index
    %c0_23 = arith.constant 0 : index
    %57 = vector.load %arg11[%c0_22, %c0_23] : memref<8x1xf32, #tpu.memory_space<vmem>>, vector<8x1xf32>
    %c0_24 = arith.constant 0 : index
    %c0_25 = arith.constant 0 : index
    %58 = vector.load %arg6[%c0_24, %c0_25] : memref<1x128xf32, #tpu.memory_space<vmem>>, vector<1x128xf32>
    %59 = vector.broadcast %57 : vector<8x1xf32> to vector<8x128xf32>
    %60 = vector.broadcast %58 : vector<1x128xf32> to vector<8x128xf32>
    %61 = arith.mulf %59, %60 : vector<8x128xf32>
    %c0_26 = arith.constant 0 : index
    %c0_27 = arith.constant 0 : index
    %62 = vector.load %arg12[%c0_26, %c0_27] : memref<8x1xf32, #tpu.memory_space<vmem>>, vector<8x1xf32>
    %c0_28 = arith.constant 0 : index
    %c0_29 = arith.constant 0 : index
    %63 = vector.load %arg7[%c0_28, %c0_29] : memref<1x128xf32, #tpu.memory_space<vmem>>, vector<1x128xf32>
    %64 = vector.broadcast %62 : vector<8x1xf32> to vector<8x128xf32>
    %65 = vector.broadcast %63 : vector<1x128xf32> to vector<8x128xf32>
    %66 = arith.mulf %64, %65 : vector<8x128xf32>
    %67 = arith.addf %61, %66 : vector<8x128xf32>
    %c0_30 = arith.constant 0 : index
    %c0_31 = arith.constant 0 : index
    %68 = vector.load %arg8[%c0_30, %c0_31] : memref<1x128xf32, #tpu.memory_space<vmem>>, vector<1x128xf32>
    %69 = vector.broadcast %68 : vector<1x128xf32> to vector<8x128xf32>
    %70 = arith.addf %67, %69 : vector<8x128xf32>
    %71 = arith.truncf %56 : vector<8x128xf32> to vector<8x128xbf16>
    %c0_32 = arith.constant 0 : index
    %c0_33 = arith.constant 0 : index
    %72 = vector.load %arg5[%c0_32, %c0_33] : memref<128x128xbf16, #tpu.memory_space<vmem>>, vector<128x128xbf16>
    %cst_34 = arith.constant dense<0.000000e+00> : vector<8x128xf32>
    %73 = tpu.matmul %71, %72, %cst_34 {dimension_numbers = #tpu.dot_dimension_numbers<[1], [0], [0], [1], [0, 0, 1, 1], [], []>} : vector<8x128xbf16>, vector<128x128xbf16>, vector<8x128xf32> -> vector<8x128xf32>
    %74 = arith.addf %73, %70 : vector<8x128xf32>
    %75 = math.tanh %74 : vector<8x128xf32>
    %c0_35 = arith.constant 0 : index
    %c0_36 = arith.constant 0 : index
    %76 = vector.load %arg9[%c0_35, %c0_36] : memref<1x128xf32, #tpu.memory_space<vmem>>, vector<1x128xf32>
    %77 = vector.broadcast %76 : vector<1x128xf32> to vector<8x128xf32>
    %78 = arith.mulf %75, %77 : vector<8x128xf32>
    %cst_37 = arith.constant dense<0.000000e+00> : vector<8xf32>
    %79 = vector.multi_reduction <add>, %78, %cst_37 [1] : vector<8x128xf32> to vector<8xf32>
    %80 = vector.shape_cast %79 : vector<8xf32> to vector<8x1xf32>
    %c0_38 = arith.constant 0 : index
    %c0_39 = arith.constant 0 : index
    %81 = memref.load %arg10[%c0_38, %c0_39] : memref<1x1xf32, #tpu.memory_space<smem>>
    %82 = vector.broadcast %81 : f32 to vector<8x1xf32>
    %83 = arith.addf %80, %82 : vector<8x1xf32>
    %84 = vector.shape_cast %83 : vector<8x1xf32> to vector<8x1xf32>
    %85 = vector.broadcast %84 : vector<8x1xf32> to vector<8x128xf32>
    %c0_40 = arith.constant 0 : index
    %c0_41 = arith.constant 0 : index
    %86 = vector.load %arg13[%c0_40, %c0_41] : memref<8x128xf32, #tpu.memory_space<vmem>>, vector<8x128xf32>
    tpu.vector_store %arg13[%c0_40, %c0_41], %85 {strides = array<i32>} : memref<8x128xf32, #tpu.memory_space<vmem>>, vector<8x128xf32>,
    return
  }
  func.func @transform_0(%arg0: i32, %arg1: memref<16xi32, #tpu.memory_space<smem>>) -> (i32, i32) {
    %c0_i32 = arith.constant 0 : i32
    %c0_i32_0 = arith.constant 0 : i32
    %c0_i32_1 = arith.constant 0 : i32
    return %c0_i32, %c0_i32_0 : i32, i32
  }
  func.func @transform_1(%arg0: i32, %arg1: memref<16xi32, #tpu.memory_space<smem>>) -> (i32, i32) {
    %c0_i32 = arith.constant 0 : i32
    %c0_i32_0 = arith.constant 0 : i32
    %c0_i32_1 = arith.constant 0 : i32
    return %c0_i32, %c0_i32_0 : i32, i32
  }
  func.func @transform_2(%arg0: i32, %arg1: memref<16xi32, #tpu.memory_space<smem>>) -> (i32, i32) {
    %c0_i32 = arith.constant 0 : i32
    %c0_i32_0 = arith.constant 0 : i32
    %c0_i32_1 = arith.constant 0 : i32
    return %c0_i32, %c0_i32_0 : i32, i32
  }
  func.func @transform_3(%arg0: i32, %arg1: memref<16xi32, #tpu.memory_space<smem>>) -> (i32, i32) {
    %c0_i32 = arith.constant 0 : i32
    %c0_i32_0 = arith.constant 0 : i32
    %c0_i32_1 = arith.constant 0 : i32
    return %c0_i32, %c0_i32_0 : i32, i32
  }
  func.func @transform_4(%arg0: i32, %arg1: memref<16xi32, #tpu.memory_space<smem>>) -> (i32, i32) {
    %c0_i32 = arith.constant 0 : i32
    %c0_i32_0 = arith.constant 0 : i32
    %c0_i32_1 = arith.constant 0 : i32
    return %c0_i32, %c0_i32_0 : i32, i32
  }
  func.func @transform_5(%arg0: i32, %arg1: memref<16xi32, #tpu.memory_space<smem>>) -> (i32, i32) {
    %c0_i32 = arith.constant 0 : i32
    %c0_i32_0 = arith.constant 0 : i32
    %c0_i32_1 = arith.constant 0 : i32
    return %c0_i32, %c0_i32_0 : i32, i32
  }
  func.func @transform_6(%arg0: i32, %arg1: memref<16xi32, #tpu.memory_space<smem>>) -> (i32, i32) {
    %c0_i32 = arith.constant 0 : i32
    %c0_i32_0 = arith.constant 0 : i32
    %c0_i32_1 = arith.constant 0 : i32
    return %c0_i32, %c0_i32_0 : i32, i32
  }
  func.func @transform_7(%arg0: i32, %arg1: memref<16xi32, #tpu.memory_space<smem>>) -> (i32, i32) {
    %c0_i32 = arith.constant 0 : i32
    %c0_i32_0 = arith.constant 0 : i32
    %c0_i32_1 = arith.constant 0 : i32
    return %c0_i32, %c0_i32_0 : i32, i32
  }
  func.func @transform_8(%arg0: i32, %arg1: memref<16xi32, #tpu.memory_space<smem>>) -> (i32, i32) {
    %c0_i32 = arith.constant 0 : i32
    %c0_i32_0 = arith.constant 0 : i32
    %c0_i32_1 = arith.constant 0 : i32
    return %c0_i32, %c0_i32_0 : i32, i32
  }
  func.func @transform_9(%arg0: i32, %arg1: memref<16xi32, #tpu.memory_space<smem>>) -> (i32, i32) {
    %c0_i32 = arith.constant 0 : i32
    %c0_i32_0 = arith.constant 0 : i32
    return %arg0, %c0_i32 : i32, i32
  }
  func.func @transform_10(%arg0: i32, %arg1: memref<16xi32, #tpu.memory_space<smem>>) -> (i32, i32) {
    %c0_i32 = arith.constant 0 : i32
    %c0_i32_0 = arith.constant 0 : i32
    return %arg0, %c0_i32 : i32, i32
  }
  func.func @transform_11(%arg0: i32, %arg1: memref<16xi32, #tpu.memory_space<smem>>) -> (i32, i32) {
    %c0_i32 = arith.constant 0 : i32
    %c0_i32_0 = arith.constant 0 : i32
    return %arg0, %c0_i32 : i32, i32
  }
}

</mosaic_0001>

<bundles_post_ra>
// kernel: tpu_custom_call.1
= control target key start
LH: loop header
LB: loop body
LE: loop exit
PB: predicated region body
PF: predicated region fallthrough
CT: control target
= control target key end

     0   :  { %s1582_s0 = inlined_call_operand.vmem [shape: s32[16], index: 0, kind: input, shape index: {}]   ;;  %s1583_s1 = inlined_call_operand.hbm [shape: f32[64,128], index: 1, kind: input, shape index: {}]   ;;  %s1584_s2 = inlined_call_operand.hbm [shape: bf16[128,128], index: 2, kind: input, shape index: {}]   ;;  %s1585_s3 = inlined_call_operand.vmem [shape: f32[1,128], index: 3, kind: input, shape index: {}]   ;;  %s1586_s4 = inlined_call_operand.hbm [shape: bf16[128,128], index: 4, kind: input, shape index: {}]   ;;  %s1587_s5 = inlined_call_operand.vmem [shape: f32[1,128], index: 5, kind: input, shape index: {}]   ;;  %s1588_s6 = inlined_call_operand.vmem [shape: f32[1,128], index: 6, kind: input, shape index: {}]   ;;  %s1589_s7 = inlined_call_operand.vmem [shape: f32[1,128], index: 7, kind: input, shape index: {}]   ;;  %s1590_s8 = inlined_call_operand.vmem [shape: f32[1,128], index: 8, kind: input, shape index: {}]   ;;  %s1591_s9 = inlined_call_operand.<no memory space> [shape: f32[1,1], index: 9, kind: input, shape index: {}]   ;;  %s1592_s10 = inlined_call_operand.vmem [shape: f32[16,1], index: 10, kind: input, shape index: {}]   ;;  %s1593_s11 = inlined_call_operand.vmem [shape: f32[16,1], index: 11, kind: input, shape index: {}]   ;;  %s1594_s12 = inlined_call_operand.hbm [shape: f32[16,128], index: 12, kind: output, shape index: {}]  }
   0x1   :  { %1605 = sst [smem:[#allocation22_spill]] %s1584_s2  ;;  %s17_s23 = sshll.u32 %s1582_s0, 4  ;;  %s18_s23 = int_to_ptr.vmem [resolvable:$true] %s17_s23 }
   0x2   :  { %21 = sst [smem:[#allocation5]] %s1591_s9  ;;  %s1083_s26 = scalar_lea.vmem %s18_s23, 16 }
   0x3   :  { %p1084_p0 = scmp.ne.s32.totalorder %s18_s23, %s1083_s26  ;;  %p1088_p1 = scmp.lt.s32.totalorder %s18_s23, %s18_s23 }
   0x4   :  { %p1089_p2 = scmp.lt.s32.totalorder %s1083_s26, %s1083_s26 }
   0x6   :  { %p1090_p3 = por %p1089_p2, %p1088_p1 }
   0x8   :  { %p1091_p4 = pnand %p1090_p3, %p1084_p0 }
   0xa   :  { %1094 = shalt.err (!%p1091_p4)  }
   0xb   :  { %s1253_s27 = smov [#allocation4]  }
   0xc   :  { %20 = dma.vmem_to_smem %s18_s23, 16, %s1253_s27, [#allocation3] }
   0xd   :  { %1223 = dma.done.wait [#allocation3], 16 }
   0xe   :  { %1224 = vsyncadd [#allocation3], 4294967280 }
   0xf   :  { %23 = sfence }
  0x10   :  { %24 = vsyncpa [#allocation7], 0 }
  0x11   :  { %25 = vsyncpa [#allocation10], 0 }
  0x12   :  { %26 = vsyncpa [#allocation8], 0 }
  0x13   :  { %28 = vsyncpa [#allocation8 + $0x1], 0  ;;  %s1336_s0 = smov 0   ;;  %s1338_s9 = smov 0  }
  0x14   :  { %s1340_s28 = smov 0   ;;  %s1342_s29 = smov 0  }
  0x15 LB: > { %1606 = sst [smem:[#allocation17_spill]] %s1239_s0  ;;  %s1357_s30 = sadd.s32 4294967295, %s1251_s29   ;;  %s1251_s29 = sphi %s1342_s29, %s1628_s29   ;;  %s1247_s28 = sphi %s1340_s28, %s1630_s28   ;;  %s1243_s9 = sphi %s1338_s9, %s1632_s9   ;;  %s1239_s0 = sphi %s1336_s0, %s1631_s0  }
  0x16   : > { %1607 = sst [smem:[#allocation18_spill]] %s1247_s28  ;;  %s887_s13 = sadd.s32 4294967294, %s1251_s29  }
  0x17   : > { %s1361_s14 = sadd.s32 1, %s1251_s29   ;;  %s282_s15 = sadd.s32 1, %s1247_s28 }
  0x18   : > { %1608 = sst [smem:[#allocation19_spill]] %s1361_s14  ;;  %s279_s16 = ssub.s32 %s1251_s29, %s1361_s14 }
  0x19   : > { %p292_p5 = scmp.ne.s32.totalorder %s1247_s28, %s1243_s9  ;;  %p280_p6 = scmp.eq.s32.totalorder %s279_s16, 0 }
  0x1a   : > { %p293_p7 = scmp.eq.s32.totalorder %s1357_s30, 1  ;;  %p298_p8 = scmp.ne.s32.totalorder %s1243_s9, %s1239_s0 }
  0x1b   : > { %p299_p9 = scmp.eq.s32.totalorder %s887_s13, 1  ;;  %p888_p12 = scmp.ge.s32.totalorder %s1251_s29, 1 }
  0x1c   : > { %s1372_s17 = scalar_select %p280_p6, %s1247_s28, %s282_s15  }
  0x1d   : > { %p1374_p10 = por %p293_p7, %p292_p5  ;;  %p1378_p11 = por %p299_p9, %p298_p8 }
  0x1e   : > { %1609 = sst [smem:[#allocation20_spill]] %s1372_s17  ;;  %p306_p13 = scmp.lt.s32.totalorder %s1251_s29, 3 }
  0x1f   : > { %s1610_s18 = scalar_select %p1374_p10, 1, 0 }
  0x20   : > { %s1611_s19 = scalar_select %p1378_p11, 1, 0 }
  0x21   : > { %p1595_p0 = scmp.eq.s32.totalorder %s1357_s30, 0  ;;  %p1385_p1 = pnand %p888_p12, %p306_p13 }
  0x22   : > { %1612 = sst [smem:[#allocation21_spill]] %s1611_s19  ;;  %s1254_s21 = smov [#allocation9]  }
  0x23   : > { %s1613_s20 = scalar_select %p1385_p1, 1, 0 }
  0x24   : > { %s331_s22 = sshll.u32 %s1254_s21, 4  ;;  %p998_p2 = pneg %p1385_p1  ;;  %s332_s22 = int_to_ptr.vmem [resolvable:$true] %s331_s22 }
  0x25   : > { %s1255_s24 = smov [#allocation6]   ;;  %s1615_s2 = sld [smem:[#allocation22_spill]] }
  0x26   : > { %p1393_p3 = pnand %p1595_p0, %p998_p2  ;;  %s318_s25 = sshll.u32 %s1255_s24, 4  ;;  %s1397_s25 = int_to_ptr.vmem [resolvable:$true] %s318_s25 }
  0x28   : > { %p1407_p5 = pneg %p1393_p3 }
  0x2b   : > { %s1095_s13 = scalar_lea.hbm %s1615_s2, 1024 }
  0x2c   : > { %p1096_p4 = scmp.ne.s32.totalorder %s1615_s2, %s1095_s13  ;;  %p1102_p8 = scmp.lt.u32.totalorder %s1095_s13, %s1615_s2 }
  0x2e   : > { %p1098_p6 = pnand %p1407_p5, %p1096_p4 }
  0x30   : > { %p1099_p7 = pneg %p1098_p6 }
  0x32   : > { %p1104_p9 = pnand %p1102_p8, %p1099_p7 }
  0x34   : > { %1107 = shalt.err (!%p1104_p9)
}
  0x35   : > { %s1108_s26 = scalar_lea.vmem %s332_s22, 1024  ;;  %p1116_p0 = scmp.lt.s32.totalorder %s332_s22, %s332_s22 }
  0x36   : > { %p1109_p12 = scmp.ne.s32.totalorder %s332_s22, %s1108_s26  ;;  %p1117_p11 = scmp.lt.s32.totalorder %s1108_s26, %s1108_s26 }
  0x38   : > { %p1111_p13 = pnand %p1109_p12, %p1407_p5  ;;  %p1118_p10 = por %p1117_p11, %p1116_p0 }
  0x3a   : > { %p1112_p2 = pneg %p1111_p13 }
  0x3c   : > { %p1119_p1 = pnand %p1118_p10, %p1112_p2 }
  0x3e   : > { %1122 = shalt.err (!%p1119_p1)
}
  0x3f   : > { %s1603_s27 = smov 64   ;;  %s1604_s15 = smov 4  }
  0x40   : > { %1004 = dma.hbm_to_vmem [thread:$0]  (!%p1393_p3), %s1615_s2, 1024, %s332_s22, [#allocation10], %s1603_s27, %s1603_s27, %s1604_s15  }
  0x41   : > { %s1123_s28 = scalar_lea.hbm %s1583_s1, 1024 }
  0x42   : > { %p1124_p10 = scmp.ne.s32.totalorder %s1583_s1, %s1123_s28  ;;  %p1130_p1 = scmp.lt.u32.totalorder %s1123_s28, %s1583_s1 }
  0x44   : > { %p1126_p11 = pnand %p1124_p10, %p1407_p5 }
  0x46   : > { %p1127_p0 = pneg %p1126_p11 }
  0x48   : > { %p1132_p4 = pnand %p1130_p1, %p1127_p0 }
  0x4a   : > { %1135 = shalt.err (!%p1132_p4)
}
  0x4b   : > { %s1136_s22 = scalar_lea.vmem %s1397_s25, 1024  ;;  %p1144_p9 = scmp.lt.s32.totalorder %s1397_s25, %s1397_s25 }
  0x4c   : > { %p1137_p6 = scmp.ne.s32.totalorder %s1397_s25, %s1136_s22  ;;  %p1145_p12 = scmp.lt.s32.totalorder %s1136_s22, %s1136_s22 }
  0x4e   : > { %p1139_p7 = pnand %p1137_p6, %p1407_p5  ;;  %p1146_p13 = por %p1145_p12, %p1144_p9 }
  0x50   : > { %p1140_p8 = pneg %p1139_p7 }
  0x52   : > { %p1147_p2 = pnand %p1146_p13, %p1140_p8 }
  0x54   : > { %1150 = shalt.err (!%p1147_p2)
}
  0x55   : > { %s1258_s14 = smov 128   ;;  %s1259_s0 = smov 8  }
  0x56   : > { %1001 = dma.hbm_to_vmem [thread:$0]  (!%p1393_p3), %s1583_s1, 1024, %s1397_s25, [#allocation7], %s1258_s14, %s1258_s14, %s1259_s0  }
  0x57   : > { %s1260_s17 = smov [#allocation11]   ;;  %s1151_s26 = scalar_lea.hbm %s1586_s4, 1024 }
  0x58   : > { %s347_s13 = sshll.u32 %s1260_s17, 4  ;;  %p1152_p10 = scmp.ne.s32.totalorder %s1586_s4, %s1151_s26  ;;  %s348_s13 = int_to_ptr.vmem [resolvable:$true] %s347_s13 }
  0x59   : > { %p1158_p1 = scmp.lt.u32.totalorder %s1151_s26, %s1586_s4 }
  0x5a   : > { %p1154_p11 = pnand %p1152_p10, %p1407_p5 }
  0x5c   : > { %p1155_p0 = pneg %p1154_p11 }
  0x5e   : > { %p1160_p4 = pnand %p1158_p1, %p1155_p0 }
  0x60   : > { %1163 = shalt.err (!%p1160_p4)
}
  0x61   : > { %s1164_s25 = scalar_lea.vmem %s348_s13, 1024  ;;  %p1172_p9 = scmp.lt.s32.totalorder %s348_s13, %s348_s13 }
  0x62   : > { %p1165_p6 = scmp.ne.s32.totalorder %s348_s13, %s1164_s25  ;;  %p1173_p12 = scmp.lt.s32.totalorder %s1164_s25, %s1164_s25 }
  0x64   : > { %p1167_p7 = pnand %p1165_p6, %p1407_p5  ;;  %p1174_p13 = por %p1173_p12, %p1172_p9 }
  0x66   : > { %p1168_p8 = pneg %p1167_p7 }
  0x68   : > { %p1175_p2 = pnand %p1174_p13, %p1168_p8 }
  0x6a   : > { %1178 = shalt.err (!%p1175_p2)
}
  0x6b   : > { %s1617_s27 = smov 4   ;;  %s1618_s14 = smov 64  }
  0x6c   : > { %1007 = dma.hbm_to_vmem [thread:$0]  (!%p1393_p3), %s1586_s4, 1024, %s348_s13, [#allocation10], %s1618_s14, %s1618_s14, %s1617_s27  }
  0x6d   : > { %p1619_p10 = scmp.ne.s32.totalorder %s1613_s20, 0 }
  0x6e   : > { %p1620_p5 = scmp.eq.s32.totalorder (!%p1619_p10), %s1357_s30, 0 }
  0x6f   : > { %392 = sbr.rel (%p1619_p10) target bundleno = 768 (0x300), region = 64 }
  0x76   : > { %1226 = dma.done.wait (%p1620_p5), [#allocation7], 1024   ;;  %p1621_p11 = pmov %p1620_p5 }
  0x77   : > { %p1622_p0 = pmov %p1620_p5 }
  0x78   : > { %1228 = vsyncadd (%p1621_p11), [#allocation7], 4294966272 }
  0x79   : > { %1230 = dma.done.wait (%p1622_p0), [#allocation10], 2048   ;;  %p1623_p1 = pmov %p1622_p0 }
  0x7a   : > { %s1481_s23 = sshll.u32 %s1357_s30, 3  ;;  %v1261_v0 = vmov 0.0   ;;  %vm1262_vm0 = vmmov 0   ;;  %v1063_v1 = vld [vmem:[#allocation9] sm:$0xff]   ;;  %v1064_v2 = vld [vmem:[#allocation9 + $0x8] sm:$0xff]   ;;  %v1065_v3 = vld [vmem:[#allocation9 + $0x10] sm:$0xff]  }
  0x7b   : > { %1232 = vsyncadd (%p1623_p1), [#allocation10], 4294965248  ;;  %944 = vmatprep.subr.bf16.mxu0 %v1261_v0  ;;  %960 = vmatprep.mubr.msk.bf16.mxu0 %vm1262_vm0, %v1261_v0  ;;  %s453_s20 = sld [smem:[#allocation4 + %s1481_s23]]  ;;  %s457_s21 = sadd.s32 1, %s1481_s23  ;;  %v1066_v4 = vld [vmem:[#allocation9 + $0x18] sm:$0xff]   ;;  %v1071_v11 = vld [vmem:[#allocation11] sm:$0xff]  }
  0x7c   : > { %s458_s0 = sld [smem:[#allocation4 + %s457_s21]]  ;;  %s462_s28 = sadd.s32 2, %s1481_s23  ;;  %964 = vmatprep.subr.bf16.mxu1 %v1261_v0  ;;  %980 = vmatprep.mubr.msk.bf16.mxu1 %vm1262_vm0, %v1261_v0  ;;  %v1072_v12 = vld [vmem:[#allocation11 + $0x8] sm:$0xff]   ;;  %v1067_v14 = vld [vmem:[#allocation9 + $0x20] sm:$0xff]   ;;  %v1073_v15 = vld [vmem:[#allocation11 + $0x10] sm:$0xff]   ;;  %v1263_v27 = vmov 0  }
  0x7d   : > { %s463_s19 = sld [smem:[#allocation4 + %s462_s28]]  ;;  %s467_s17 = sadd.s32 3, %s1481_s23  ;;  %945 = vmatpush3.bf16.msra.mxu0 %v1063_v1  ;;  %965 = vmatpush3.bf16.msra.mxu1 %v1071_v11  ;;  %v1068_v17 = vld [vmem:[#allocation9 + $0x28] sm:$0xff]   ;;  %v1074_v18 = vld [vmem:[#allocation11 + $0x18] sm:$0xff]   ;;  %v1069_v19 = vld [vmem:[#allocation9 + $0x30] sm:$0xff]  }
  0x7e   : > { %s468_s13 = sld [smem:[#allocation4 + %s467_s17]]  ;;  %s472_s16 = sadd.s32 4, %s1481_s23  ;;  %946 = vmatprep.subr.bf16.mxu0 %v1261_v0  ;;  %966 = vmatprep.subr.bf16.mxu1 %v1261_v0  ;;  %v1070_v20 = vld [vmem:[#allocation9 + $0x38] sm:$0xff]   ;;  %v1075_v23 = vld [vmem:[#allocation11 + $0x20] sm:$0xff]   ;;  %v1076_v24 = vld [vmem:[#allocation11 + $0x28] sm:$0xff]  }
  0x7f   : > { %s473_s24 = sld [smem:[#allocation4 + %s472_s16]]  ;;  %s477_s26 = sadd.s32 5, %s1481_s23  ;;  %v1077_v25 = vld [vmem:[#allocation11 + $0x30] sm:$0xff]   ;;  %v1078_v26 = vld [vmem:[#allocation11 + $0x38] sm:$0xff]   ;;  %1062 = vset.pattern.permute.xlu0 %v1263_v27 }
  0x80   : > { %s478_s22 = sld [smem:[#allocation4 + %s477_s26]]  ;;  %s482_s25 = sadd.s32 6, %s1481_s23  ;;  %v901_v30 = vld [vmem:[%s1585_s3] ss:$0 sm:$0xff] }
  0x81   : > { %947 = vmatpush3.bf16.msra.mxu0 %v1064_v2  ;;  %s1495_s27 = sld [smem:[#allocation4 + %s482_s25]]  ;;  %s487_s14 = sadd.s32 7, %s1481_s23  ;;  %967 = vmatpush3.bf16.msra.mxu1 %v1072_v12  ;;  %v910_v39 = vld [vmem:[%s1587_s5] ss:$0 sm:$0xff] }
  0x82   : > { %948 = vmatprep.subr.bf16.mxu0 %v1261_v0  ;;  %s454_s2 = scalar_lea.vmem [#allocation6], %s453_s20  ;;  %s459_s15 = scalar_lea.vmem [#allocation6], %s458_s0  ;;  %968 = vmatprep.subr.bf16.mxu1 %v1261_v0  ;;  %v911_v40 = vld [vmem:[%s1588_s6] ss:$0 sm:$0xff] }
  0x83   : > { %v455_v5 = vld [vmem:[%s454_s2] sm:$0x1]  ;;  %s464_s21 = scalar_lea.vmem [#allocation6], %s463_s19  ;;  %s488_s23 = sld [smem:[#allocation4 + %s487_s14]] }
  0x84   : > { %v460_v6 = vld [vmem:[%s459_s15] sm:$0x1]  ;;  %456 = vst [vmem:[#allocation2] sm:$0x1] %v455_v5  ;;  %s469_s28 = scalar_lea.vmem [#allocation6], %s468_s13  ;;  %p443_p3 = scmp.lt.s32.totalorder %s1357_s30, 1 }
  0x85   : > { %v465_v7 = vld [vmem:[%s464_s21] sm:$0x1]  ;;  %461 = vst [vmem:[#allocation2 + $0x1] sm:$0x1] %v460_v6  ;;  %s474_s17 = scalar_lea.vmem [#allocation6], %s473_s24  ;;  %949 = vmatpush3.bf16.msra.mxu0 %v1065_v3  ;;  %969 = vmatpush3.bf16.msra.mxu1 %v1073_v15  ;;  %s759_s24 = sld [smem:[#allocation5]] }
  0x86   : > { %466 = vst [vmem:[#allocation2 + $0x2] sm:$0x1] %v465_v7  ;;  %v470_v8 = vld [vmem:[%s469_s28] sm:$0x1]  ;;  %s479_s16 = scalar_lea.vmem [#allocation6], %s478_s22  ;;  %950 = vmatprep.subr.bf16.mxu0 %v1261_v0  ;;  %970 = vmatprep.subr.bf16.mxu1 %v1261_v0  ;;  %p1624_p6 = scmp.ne.s32.totalorder %s1610_s18, 0 }
  0x87   : > { %v475_v9 = vld [vmem:[%s474_s17] sm:$0x1]  ;;  %471 = vst [vmem:[#allocation2 + $0x3] sm:$0x1] %v470_v8  ;;  %s484_s20 = scalar_lea.vmem [#allocation6], %s1495_s27 }
  0x88   : > { %v480_v10 = vld [vmem:[%s479_s16] sm:$0x1]  ;;  %476 = vst [vmem:[#allocation2 + $0x4] sm:$0x1] %v475_v9  ;;  %s444_s19 = scalar_select %p443_p3, %s1357_s30, 1 }
  0x89   : > { %481 = vst [vmem:[#allocation2 + $0x5] sm:$0x1] %v480_v10  ;;  %v485_v13 = vld [vmem:[%s484_s20] sm:$0x1]  ;;  %951 = vmatpush3.bf16.msra.mxu0 %v1066_v4  ;;  %s489_s0 = scalar_lea.vmem [#allocation6], %s488_s23  ;;  %971 = vmatpush3.bf16.msra.mxu1 %v1074_v18 }
  0x8a   : > { %486 = vst [vmem:[#allocation2 + $0x6] sm:$0x1] %v485_v13  ;;  %952 = vmatprep.subr.bf16.mxu0 %v1261_v0  ;;  %v490_v16 = vld [vmem:[%s489_s0] sm:$0x1]  ;;  %972 = vmatprep.subr.bf16.mxu1 %v1261_v0  ;;  %s898_s13 = sshll.u32 %s444_s19, 3 }
  0x8b   : > { %491 = vst [vmem:[#allocation2 + $0x7] sm:$0x1] %v490_v16  ;;  %s446_s22 = scalar_lea.vmem %s1592_s10, %s898_s13  ;;  %s450_s14 = scalar_lea.vmem %s1593_s11, %s898_s13  ;;  %v912_v45 = vld [vmem:[%s1589_s7] ss:$0 sm:$0xff]  ;;  %v760_v55 = vstv %s759_s24 }
  0x8c   : > { %v606_v28 = vld [vmem:[%s446_s22] sm:$0xff]  ;;  %s440_s13 = sand.u32 1, %s1243_s9   ;;  %s923_s22 = sshll.u32 %s1357_s30, 7 }
  0x8d   : > { %953 = vmatpush3.bf16.msra.mxu0 %v1067_v14  ;;  %973 = vmatpush3.bf16.msra.mxu1 %v1075_v23  ;;  %v620_v29 = vld [vmem:[%s450_s14] sm:$0xff]  ;;  %s897_s26 = sshll.u32 %s440_s13, 3  ;;  %s1540_s15 = scalar_lea.hbm %s1594_s12, %s923_s22 }
  0x8e   : > { %954 = vmatprep.subr.bf16.mxu0 %v1261_v0  ;;  %974 = vmatprep.subr.bf16.mxu1 %v1261_v0  ;;  %v921_v52 = vld [vmem:[%s1590_s8] ss:$0 sm:$0xff]  ;;  %s442_s25 = scalar_lea.vmem [#allocation12], %s897_s26  ;;  %s764_s21 = scalar_lea.sflag [#allocation8], %s440_s13 }
  0x8f   : > { %610 = vperm.xlu0 %1062, %v606_v28   ;;  %s777_s27 = sshll.u32 %s442_s25, 4  ;;  %s1264_s30 = smov [#allocation12]   ;;  %s1542_s27 = int_to_ptr.vmem [resolvable:$true] %s777_s27 }
  0x90   : > { %s1179_s28 = scalar_lea.vmem %s1542_s27, 128  ;;  %s1183_s17 = sshll.u32 %s1264_s30, 4  ;;  %s1184_s17 = int_to_ptr.vmem [resolvable:$false] %s1183_s17 }
  0x91   : > { %955 = vmatpush3.bf16.msra.mxu0 %v1068_v17  ;;  %975 = vmatpush3.bf16.msra.mxu1 %v1076_v24  ;;  %p1180_p4 = scmp.ne.s32.totalorder %s1542_s27, %s1179_s28  ;;  %s1185_s16 = scalar_lea.vmem %s1184_s17, 256 }
  0x92   : > { %956 = vmatprep.subr.bf16.mxu0 %v1261_v0  ;;  %v492_v21 = vld [vmem:[#allocation2] sm:$0xff]  ;;  %976 = vmatprep.subr.bf16.mxu1 %v1261_v0  ;;  %p1186_p9 = scmp.lt.s32.totalorder %s1542_s27, %s1184_s17  ;;  %p1187_p12 = scmp.lt.s32.totalorder %s1185_s16, %s1179_s28 }
  0x93   : > { %v493_v22 = vpack.c.bf16 %v492_v21, %v492_v21  ;;  %624 = vperm.xlu0 %1062, %v620_v29   ;;  %p1181_p7 = pnand %p1180_p4, %p1624_p6 }
  0x94   : > { %p1188_p13 = por %p1187_p12, %p1186_p9 }
  0x95   : > { %957 = vmatpush3.bf16.msra.mxu0 %v1069_v19  ;;  %977 = vmatpush3.bf16.msra.mxu1 %v1077_v25  ;;  %p1182_p8 = pneg %p1181_p7 }
  0x96   : > { %958 = vmatprep.subr.bf16.mxu0 %v1261_v0  ;;  %978 = vmatprep.subr.bf16.mxu1 %v1261_v0 }
  0x97   : > { %p1189_p2 = pnand %p1188_p13, %p1182_p8 }
  0x99   : > { %959 = vmatpush3.bf16.msra.mxu0 %v1070_v20  ;;  %979 = vmatpush3.bf16.msra.mxu1 %v1078_v26 }
  0x9c   : > { %961 = vmatmul.mubr.bf16.vlgmr.msra.gmra.mrb[0].mxu0 %v493_v22 }
 0x10e   : > { %v611_v38 = vpop.permute.xlu0 %610 }
 0x10f   : > { %v619_v42 = vmul.f32 %v910_v39, %v611_v38 }
 0x112   : > { %v625_v41 = vpop.permute.xlu0 %624 }
 0x113   : > { %v633_v43 = vmul.f32 %v911_v40, %v625_v41 }
 0x115   : > { %v634_v44 = vadd.f32 %v633_v43, %v619_v42 }
 0x117   : > { %v642_v46 = vadd.f32 %v912_v45, %v634_v44 }
 0x16f   : > { %v599_v31 = vpop.f32.mrb[0].mxu0 }
 0x170   : > { %v600_v32 = vadd.f32 %v901_v30, %v599_v31  ;;  %v962_v33 = vpop.f32.mrb[1].mxu0 }
 0x171   : > { %v602_v34 = vpop.f32.mrb[2].mxu0 }
 0x172   : > { %1079 = vtanh.f32 %v600_v32  ;;  %v963_v35 = vpop.f32.mrb[3].mxu0 }
 0x17c   : > { %v1080_v36 = vpop.eup %1079 }
 0x17d   : > { %v643_v37 = vpack.c.bf16 %v1080_v36, %v1080_v36 }
 0x17f   : > { %981 = vmatmul.mubr.bf16.vlgmr.msra.gmra.mrb[0].mxu1 %v643_v37 }
 0x252   : > { %v742_v47 = vpop.f32.mrb[0].mxu1 }
 0x253   : > { %v743_v48 = vadd.f32 %v742_v47, %v642_v46  ;;  %v982_v49 = vpop.f32.mrb[1].mxu1 }
 0x254   : > { %v745_v50 = vpop.f32.mrb[2].mxu1 }
 0x255   : > { %1081 = vtanh.f32 %v743_v48  ;;  %v983_v51 = vpop.f32.mrb[3].mxu1 }
 0x25f   : > { %v1082_v53 = vpop.eup %1081 }
 0x260   : > { %v756_v54 = vmul.f32 %v1082_v53, %v921_v52 }
 0x262   : > { %757 = vadd.xlane.f32.xlu1 %v756_v54 }
 0x2ef   : > { %v758_v56 = vpop.xlane.xlu1 %757 }
 0x2f0   : > { %v761_v57 = vadd.f32 %v760_v55, %v758_v56 }
 0x2f2   : > { %762 = vst [vmem:[%s442_s25] sm:$0xff] %v761_v57 }
 0x2f3   : > { %1192 = shalt.err (!%p1189_p2)
}
 0x2f4   : > { %s1193_s23 = scalar_lea.hbm %s1540_s15, 128  ;;  %s1197_s19 = scalar_lea.hbm %s1594_s12, 256 }
 0x2f5   : > { %p1194_p10 = scmp.ne.s32.totalorder %s1540_s15, %s1193_s23  ;;  %p1198_p0 = scmp.lt.u32.totalorder %s1540_s15, %s1594_s12 }
 0x2f6   : > { %p1199_p1 = scmp.lt.u32.totalorder %s1197_s19, %s1193_s23  ;;  %p1201_p4 = scmp.lt.u32.totalorder %s1193_s23, %s1540_s15 }
 0x2f7   : > { %p1195_p5 = pnand %p1194_p10, %p1624_p6 }
 0x2f8   : > { %p1200_p3 = por %p1199_p1, %p1198_p0 }
 0x2f9   : > { %p1196_p11 = pneg %p1195_p5 }
 0x2fa   : > { %p1202_p7 = por %p1201_p4, %p1200_p3 }
 0x2fc   : > { %p1203_p8 = pnand %p1202_p7, %p1196_p11 }
 0x2fe   : > { %1206 = shalt.err (!%p1203_p8)
}
 0x2ff   : > { %996 = dma.vmem_to_hbm [thread:$0]  (%p1624_p6), %s1542_s27, 128, %s1540_s15, %s764_s21  }
 0x300 PF: > { %s1625_s26 = sld [smem:[#allocation17_spill]]  ;;  %s1626_s22 = sld [smem:[#allocation21_spill]] }
 0x301   : > { %p1018_p9 = scmp.ge.s32.totalorder %s1251_s29, 2 }
 0x306   : > { %s789_s25 = sand.u32 1, %s1625_s26   ;;  %p1627_p12 = scmp.ne.s32.totalorder %s1626_s22, 0 }
 0x307   : > { %s790_s14 = scalar_lea.sflag [#allocation8], %s789_s25 }
 0x308   : > { %p1009_p13 = pnand %p1018_p9, %p1627_p12 }
 0x30a   : > { %1234 = dma.done.wait (!%p1009_p13), %s790_s14, 128  }
 0x30b   : > { %1236 = vsyncadd (!%p1009_p13), %s790_s14, 4294967168  ;;  %s1628_s29 = sld [smem:[#allocation19_spill]]  ;;  %s1629_s2 = sld [smem:[#allocation18_spill]] }
 0x30c   : > { %s1630_s28 = sld [smem:[#allocation20_spill]]  ;;  %s1631_s0 = smov %s1243_s9 }
 0x311   : > { %p31_p2 = scmp.ge.s32.totalorder %s1628_s29, 4   ;;  %s1632_s9 = smov %s1629_s2 }
 0x313   :  { %33 = sbr.rel (!%p31_p2) target bundleno = 21 (0x15), region = 123 }
 0x31a   :  { %795 = vsyncpa [#allocation7], 1 }
 0x31b   :  { %797 = vsyncpa [#allocation7 + $0x1], 1 }
 0x31c   :  { %798 = vsyncpa [#allocation10], 1 }
 0x31d   :  { %799 = vsyncpa [#allocation8], 1 }
 0x31e   :  { %801 = vsyncpa [#allocation8 + $0x1], 1 }

</bundles_post_ra>
